<compile_context>
chip_gen: v7x
topology: tpu7x:2x2x1
jax: 0.10.0
libtpu: 0.0.40
codegen_flags: <defaults>
</compile_context>

<pallas_src>
import functools

import jax
import jax.numpy as jnp
from jax import lax
from jax.experimental import pallas as pl
from jax.experimental.pallas import tpu as pltpu


def _ltcm_kernel(x_ref, c_ref, b_ref, o_ref, acc_ref, *, tf_total, needs_mask):
    # x_ref  : (B_TILE, L_TILE)  input tile, native dtype, VMEM
    # c_ref  : (1, L_TILE)       fused conv+mean coefficients (f32), VMEM
    # b_ref  : (1,)              conv bias (f32), SMEM scalar
    # o_ref  : (B_TILE, 1)       per-batch result (f32), resident across L axis
    # acc_ref: (B_TILE, ACC_W)   lane-dense f32 accumulator scratch
    l = pl.program_id(1)
    b_tile, l_tile = x_ref.shape
    acc_w = acc_ref.shape[-1]

    @pl.when(l == 0)
    def _init():
        acc_ref[...] = jnp.zeros_like(acc_ref)

    x = x_ref[...].astype(jnp.float32)          # upcast per tile only
    prod = x * c_ref[...]                       # (B_TILE, L_TILE) f32

    if needs_mask:
        # Zero the padded lanes of the last (partial) L block.  jnp.where
        # selects 0 even if the out-of-bounds data is NaN/Inf.
        col = lax.broadcasted_iota(jnp.int32, prod.shape, 1) + l * l_tile
        prod = jnp.where(col < tf_total, prod, 0.0)

    # Lane-dense accumulation: fold L_TILE down to ACC_W lanes with VALU adds
    # over static, lane-aligned slices (free views).  The cross-lane (XLU)
    # reduction and the 1-lane masked output store happen only at finalize.
    folded = prod[:, 0:acc_w]
    for j in range(1, l_tile // acc_w):
        folded = folded + prod[:, j * acc_w:(j + 1) * acc_w]
    acc_ref[...] += folded

    @pl.when(l == pl.num_programs(1) - 1)
    def _finalize():
        o_ref[...] = jnp.sum(acc_ref[...], axis=-1, keepdims=True) + b_ref[0]


def _round_up(x, m):
    return ((x + m - 1) // m) * m


def _round_down(x, m):
    return (x // m) * m


def _pick_tiles(B, TF, itemsize, x_buffer_bytes):
    """Dtype-aware, VMEM-budget-driven (B_TILE, L_TILE)."""
    # Sub-32-bit dtypes pack along sublanes: align B_TILE accordingly.
    sub_align = max(8, 32 // max(1, itemsize))          # 8 f32, 16 bf16, 32 i8
    b_cap = 256

    if B <= sub_align:
        b_tile = B                                       # block == full dim is legal
    else:
        # >=2 B tiles so the "parallel" axis can shard across both v7x TCs.
        n_b = max(2, pl.cdiv(B, b_cap))
        b_tile = min(b_cap, _round_up(pl.cdiv(B, n_b), sub_align))

    # L_TILE: as large as the per-buffer budget allows, multiple of 128,
    # never exceeding the (128-aligned floor of) TF.
    if TF < 128:
        l_tile = TF                                      # block == full dim is legal
    else:
        l_tile = _round_down(x_buffer_bytes // (b_tile * itemsize), 128)
        l_tile = max(128, l_tile)
        l_tile = min(l_tile, _round_down(TF, 128))
    return b_tile, l_tile


def _conv_mean_coeffs(weight, T, padding):
    """c[t, f] such that mean_t(conv1d(x)) = bias + sum_{t,f} x[t,f] * c[t,f]."""
    F, K = weight.shape[1], weight.shape[2]
    T_out = T + 2 * padding - K + 1
    assert T_out > 0, "conv output length must be positive"
    t = jnp.arange(T)[:, None]                           # (T, 1)
    k = jnp.arange(K)[None, :]                           # (1, K)
    tout = t - k + padding
    valid = ((tout >= 0) & (tout < T_out)).astype(jnp.float32)   # (T, K)
    w0 = weight[0].astype(jnp.float32)                   # (F, K)
    c = valid @ w0.T                                     # (T, F)
    c = c / jnp.float32(T_out)                           # fold 1/T_out
    return c.reshape(1, T * F)


def ltcm_forward(x, weight, bias, *, padding=1,
                 x_buffer_bytes=12 * 1024 * 1024):
    """x: (B, T, F) any float dtype; weight: (1, F, K); bias: (1,). -> (B, 1) f32."""
    B, T, F = x.shape
    TF = T * F
    itemsize = jnp.dtype(x.dtype).itemsize

    c = _conv_mean_coeffs(weight, T, padding)            # (1, TF) f32, tiny
    x2 = x.reshape(B, TF)                                # free reshape, native dtype
    b = bias.reshape(1).astype(jnp.float32)              # SMEM scalar

    b_tile, l_tile = _pick_tiles(B, TF, itemsize, x_buffer_bytes)
    acc_w = min(128, l_tile)
    grid = (pl.cdiv(B, b_tile), pl.cdiv(TF, l_tile))
    needs_mask = (TF % l_tile) != 0

    # VMEM estimate: double-buffered x + c tiles, accumulator scratch, output.
    vmem_est = (2 * b_tile * l_tile * itemsize
                + 2 * l_tile * 4
                + b_tile * acc_w * 4
                + 2 * b_tile * 4)
    vmem_limit = min(96 * 1024 * 1024,
                     max(48 * 1024 * 1024, int(vmem_est * 3 // 2)))

    kernel = functools.partial(_ltcm_kernel, tf_total=TF, needs_mask=needs_mask)

    out = pl.pallas_call(
        kernel,
        out_shape=jax.ShapeDtypeStruct((B, 1), jnp.float32),
        grid=grid,
        in_specs=[
            pl.BlockSpec((b_tile, l_tile), lambda i, l: (i, l)),
            pl.BlockSpec((1, l_tile), lambda i, l: (0, l)),
            pl.BlockSpec(memory_space=pltpu.MemorySpace.SMEM),
        ],
        out_specs=pl.BlockSpec((b_tile, 1), lambda i, l: (i, 0)),
        scratch_shapes=[pltpu.VMEM((b_tile, acc_w), jnp.float32)],
        compiler_params=pltpu.CompilerParams(
            dimension_semantics=("parallel", "arbitrary"),
            vmem_limit_bytes=vmem_limit,
        ),
        cost_estimate=pl.CostEstimate(
            flops=2 * B * TF,
            bytes_accessed=B * TF * itemsize + TF * 4 + B * 4 + 4,
            transcendentals=0,
        ),
    )(x2, c, b)
    return out


def ltcm_reference(x, weight, bias, *, padding=1):
    """Pure-JAX reference matching torch.nn.Conv1d(F->1, K, padding) + mean(dim=2)."""
    B, T, F = x.shape
    K = weight.shape[-1]
    T_out = T + 2 * padding - K + 1
    xp = jnp.pad(x.astype(jnp.float32), ((0, 0), (padding, padding), (0, 0)))
    w = weight[0].astype(jnp.float32)                    # (F, K)
    conv = jnp.zeros((B, T_out), dtype=jnp.float32)
    for k in range(K):
        conv = conv + jnp.einsum("btf,f->bt", xp[:, k:k + T_out, :], w[:, k])
    conv = conv + bias.astype(jnp.float32)[0]
    return jnp.mean(conv, axis=1, keepdims=True)


if __name__ == "__main__":
    # Shapes consistent with the module: batch=2, num_time_steps=8,
    # num_features=4, kernel_size=3, padding=1.
    B, T, F, K = 2, 8, 4, 3
    key = jax.random.PRNGKey(0)
    kx, kw, kb = jax.random.split(key, 3)

    x = jax.random.normal(kx, (B, T, F), dtype=jnp.float32)
    weight = 0.1 * jax.random.normal(kw, (1, F, K), dtype=jnp.float32)  # Conv1d (out=1, in=F, K)
    bias = 0.1 * jax.random.normal(kb, (1,), dtype=jnp.float32)

    out = jax.block_until_ready(ltcm_forward(x, weight, bias, padding=1))
    ref = ltcm_reference(x, weight, bias, padding=1)
    assert out.shape == (B, 1), out.shape
    assert jnp.allclose(out, ref, atol=1e-5, rtol=1e-5), (out, ref)

    # Second small check that exercises the full grid machinery: a tiny
    # x-buffer budget forces L_TILE=128 -> multi-step accumulation, a partial
    # (masked) last L block (TF=800 not a multiple of 128), >=2 parallel B
    # tiles, and a partial last B block (B=18, B_TILE=16).
    B2, T2, F2 = 18, 160, 5
    kx2, kw2, kb2 = jax.random.split(jax.random.PRNGKey(1), 3)
    x2 = jax.random.normal(kx2, (B2, T2, F2), dtype=jnp.float32)
    w2 = 0.1 * jax.random.normal(kw2, (1, F2, K), dtype=jnp.float32)
    b2 = 0.1 * jax.random.normal(kb2, (1,), dtype=jnp.float32)
    out2 = jax.block_until_ready(
        ltcm_forward(x2, w2, b2, padding=1, x_buffer_bytes=4096))
    ref2 = ltcm_reference(x2, w2, b2, padding=1)
    assert jnp.allclose(out2, ref2, atol=1e-4, rtol=1e-4), (out2, ref2)

    print("KERNEL_OK")
</pallas_src>

<mosaic_0001>
module attributes {stable_mosaic.version = 11 : i64} {
  func.func @_ltcm_kernel(%arg0: i32, %arg1: i32, %arg2: memref<2x32xf32, #tpu.memory_space<vmem>>, %arg3: memref<1x32xf32, #tpu.memory_space<vmem>>, %arg4: memref<1xf32, #tpu.memory_space<smem>>, %arg5: memref<2x1xf32, #tpu.memory_space<vmem>>, %arg6: memref<2x32xf32, #tpu.memory_space<vmem>>) attributes {dimension_semantics = [#tpu.dimension_semantics<parallel>, #tpu.dimension_semantics<arbitrary>], iteration_bounds = array<i64: 1, 1>, scalar_prefetch = 0 : i64, scratch_operands = 1 : i64, tpu.core_type = #tpu.core_type<tc>, window_params = [{transform_indices = @transform_0, window_bounds = array<i64: 2, 32>}, {transform_indices = @transform_1, window_bounds = array<i64: 1, 32>}, {transform_indices = @transform_2, window_bounds = array<i64: 1>}, {transform_indices = @transform_3, window_bounds = array<i64: 2, 1>}]} {
    %c0_i32 = arith.constant 0 : i32
    %0 = arith.cmpi eq, %arg1, %c0_i32 : i32
    %1 = arith.extui %0 : i1 to i32
    %c0_i32_0 = arith.constant 0 : i32
    %2 = arith.cmpi ne, %1, %c0_i32_0 : i32
    scf.if %2 {
      %cst = arith.constant 0.000000e+00 : f32
      %13 = vector.broadcast %cst : f32 to vector<2x32xf32>
      %c0_10 = arith.constant 0 : index
      %c0_11 = arith.constant 0 : index
      %14 = vector.load %arg6[%c0_10, %c0_11] : memref<2x32xf32, #tpu.memory_space<vmem>>, vector<2x32xf32>
      tpu.vector_store %arg6[%c0_10, %c0_11], %13 {strides = array<i32>} : memref<2x32xf32, #tpu.memory_space<vmem>>, vector<2x32xf32>,
    } else {
    }
    %c0 = arith.constant 0 : index
    %c0_1 = arith.constant 0 : index
    %3 = vector.load %arg2[%c0, %c0_1] : memref<2x32xf32, #tpu.memory_space<vmem>>, vector<2x32xf32>
    %c0_2 = arith.constant 0 : index
    %c0_3 = arith.constant 0 : index
    %4 = vector.load %arg3[%c0_2, %c0_3] : memref<1x32xf32, #tpu.memory_space<vmem>>, vector<1x32xf32>
    %5 = vector.broadcast %4 : vector<1x32xf32> to vector<2x32xf32>
    %6 = arith.mulf %3, %5 : vector<2x32xf32>
    %c0_4 = arith.constant 0 : index
    %c0_5 = arith.constant 0 : index
    %7 = vector.load %arg6[%c0_4, %c0_5] : memref<2x32xf32, #tpu.memory_space<vmem>>, vector<2x32xf32>
    %8 = arith.addf %7, %6 : vector<2x32xf32>
    %c0_6 = arith.constant 0 : index
    %c0_7 = arith.constant 0 : index
    %9 = vector.load %arg6[%c0_6, %c0_7] : memref<2x32xf32, #tpu.memory_space<vmem>>, vector<2x32xf32>
    tpu.vector_store %arg6[%c0_6, %c0_7], %8 {strides = array<i32>} : memref<2x32xf32, #tpu.memory_space<vmem>>, vector<2x32xf32>,
    %c0_i32_8 = arith.constant 0 : i32
    %10 = arith.cmpi eq, %arg1, %c0_i32_8 : i32
    %11 = arith.extui %10 : i1 to i32
    %c0_i32_9 = arith.constant 0 : i32
    %12 = arith.cmpi ne, %11, %c0_i32_9 : i32
    scf.if %12 {
      %c0_10 = arith.constant 0 : index
      %c0_11 = arith.constant 0 : index
      %13 = vector.load %arg6[%c0_10, %c0_11] : memref<2x32xf32, #tpu.memory_space<vmem>>, vector<2x32xf32>
      %cst = arith.constant dense<0.000000e+00> : vector<2xf32>
      %14 = vector.multi_reduction <add>, %13, %cst [1] : vector<2x32xf32> to vector<2xf32>
      %15 = vector.shape_cast %14 : vector<2xf32> to vector<2x1xf32>
      %c0_12 = arith.constant 0 : index
      %16 = memref.load %arg4[%c0_12] : memref<1xf32, #tpu.memory_space<smem>>
      %17 = vector.broadcast %16 : f32 to vector<2x1xf32>
      %18 = arith.addf %15, %17 : vector<2x1xf32>
      %c0_13 = arith.constant 0 : index
      %c0_14 = arith.constant 0 : index
      %19 = vector.load %arg5[%c0_13, %c0_14] : memref<2x1xf32, #tpu.memory_space<vmem>>, vector<2x1xf32>
      tpu.vector_store %arg5[%c0_13, %c0_14], %18 {strides = array<i32>} : memref<2x1xf32, #tpu.memory_space<vmem>>, vector<2x1xf32>,
    } else {
    }
    return
  }
  func.func @transform_0(%arg0: i32, %arg1: i32) -> (i32, i32) {
    %c0_i32 = arith.constant 0 : i32
    return %arg0, %arg1 : i32, i32
  }
  func.func @transform_1(%arg0: i32, %arg1: i32) -> (i32, i32) {
    %c0_i32 = arith.constant 0 : i32
    %c0_i32_0 = arith.constant 0 : i32
    return %c0_i32, %arg1 : i32, i32
  }
  func.func @transform_2(%arg0: i32, %arg1: i32) -> i32 {
    %c0_i32 = arith.constant 0 : i32
    %c0_i32_0 = arith.constant 0 : i32
    return %c0_i32 : i32
  }
  func.func @transform_3(%arg0: i32, %arg1: i32) -> (i32, i32) {
    %c0_i32 = arith.constant 0 : i32
    %c0_i32_0 = arith.constant 0 : i32
    return %arg0, %c0_i32 : i32, i32
  }
}

</mosaic_0001>

<bundles_post_ra>
// kernel: tpu_custom_call.1
= control target key start
LH: loop header
LB: loop body
LE: loop exit
PB: predicated region body
PF: predicated region fallthrough
CT: control target
= control target key end

     0   :  { %vm19_vm0 = vcmask 254976   ;;  %v52_v0 = vmov 0.0   ;;  %vm44_vm1 = vcmask 1024   ;;  %s85_s0 = inlined_call_operand.vmem [shape: f32[2,32], index: 0, kind: input, shape index: {}]   ;;  %s86_s1 = inlined_call_operand.vmem [shape: f32[1,32], index: 1, kind: input, shape index: {}]   ;;  %s87_s2 = inlined_call_operand.<no memory space> [shape: f32[1], index: 2, kind: input, shape index: {}]   ;;  %s88_s3 = inlined_call_operand.vmem [shape: f32[2,1], index: 3, kind: output, shape index: {}]  }
   0x1   :  { %20 = vst.msk [vmem:[#allocation2] sm:$0x3] %vm19_vm0, %v52_v0  ;;  %v21_v1 = vld [vmem:[%s85_s0] sm:$0x3]  ;;  %v42_v8 = vstv %s87_s2 }
   0x2   :  { %v50_v2 = vld [vmem:[%s86_s1] ss:$0 sm:$0xff] }
   0x3   :  { %v29_v3 = vmul.f32 %v50_v2, %v21_v1 }
   0x8   :  { %v30_v4 = vld [vmem:[#allocation2] sm:$0x3] }
   0x9   :  { %v31_v5 = vadd.f32 %v30_v4, %v29_v3 }
   0xb   :  { %33 = vst.msk [vmem:[#allocation2] sm:$0x3] %vm19_vm0, %v31_v5 }
  0x12   :  { %v37_v6 = vld [vmem:[#allocation2] sm:$0x3] }
  0x13   :  { %v38_v7 = vsel %vm19_vm0, %v37_v6, 0.0 }
  0x14   :  { %39 = vadd.xlane.f32.xlu0 %v38_v7 }
  0xa1   :  { %v40_v9 = vpop.xlane.xlu0 %39 }
  0xa2   :  { %v43_v10 = vadd.f32 %v42_v8, %v40_v9 }
  0xa4   :  { %45 = vst.msk [vmem:[%s88_s3] sm:$0x3] %vm44_vm1, %v43_v10 }

</bundles_post_ra>
